<compile_context>
chip_gen: v7x
topology: tpu7x:2x2x1
jax: 0.10.0
libtpu: 0.0.40
codegen_flags: <defaults>
</compile_context>

<pallas_src>
import jax
import jax.numpy as jnp
from jax.experimental import pallas as pl
from jax.experimental.pallas import tpu as pltpu


_BLOCK_BUDGET_BYTES = 8 * 1024 * 1024   # ~8 MiB/block; ~4x live (dbl-buffered in+out)
_VMEM_LIMIT_BYTES = 48 * 1024 * 1024    # safe on v7x (64 MiB phys), raises v5e 16 MiB default
_FAST_PATH_BYTES = 4 * 1024 * 1024      # below this, launch/DMA setup dominates


def _copy_kernel(x_ref, o_ref):
    # Pure lane-dense 2-D tile copy: (br, bc) VMEM block in -> same block out.
    o_ref[...] = x_ref[...]


def _choose_slab(n: int, flat: int) -> tuple[int, int]:
    """Pick a lane-dense 2-D (rows, cols) view of the contiguous buffer.

    Caller guarantees (n * flat) % 128 == 0.
    """
    if flat % 128 == 0:
        return n, flat
    # flat isn't lane-aligned but the total is: decouple the copy shape from
    # (n, flat) and copy a hardware-friendly slab instead (reshape is free).
    total = n * flat
    cols = 128
    while total % (cols * 2) == 0 and cols * 2 <= 8192:
        cols *= 2
    return total // cols, cols


def _block_dims(rows: int, cols: int, itemsize: int) -> tuple[int, int]:
    """Pick (br, bc) tile sizes: dtype-aware sublane / 128-lane aligned, budgeted."""
    budget = _BLOCK_BUDGET_BYTES
    sub = max(1, 32 // itemsize)          # sublane packing: f32->8, bf16->16, int8->32

    # Lane tile first (lanes carry the bandwidth): multiple of 128 within budget.
    min_rows = min(rows, sub)
    max_cols = max(128, budget // (min_rows * itemsize))
    if cols <= max_cols:
        bc = cols
    else:
        bc = max(128, (max_cols // 128) * 128)

    # Sublane tile: multiple of the packing factor within the remaining budget.
    max_rows = max(1, budget // (bc * itemsize))
    if rows <= max_rows:
        br = rows                          # full extent (always legal)
    else:
        br = max(sub, (max_rows // sub) * sub)

    # v7x megacore: if everything fits a single block, split the flat axis so
    # both TensorCores get work -- but never below roofline-sized (>=512) tiles.
    if br == rows and bc == cols and cols >= 1024 and cols % 256 == 0:
        bc = cols // 2
    return br, bc


def _flatten_copy(x2: jax.Array) -> jax.Array:
    rows, cols = x2.shape
    br, bc = _block_dims(rows, cols, x2.dtype.itemsize)
    grid = (pl.cdiv(rows, br), pl.cdiv(cols, bc))

    return pl.pallas_call(
        _copy_kernel,
        out_shape=jax.ShapeDtypeStruct((rows, cols), x2.dtype),
        grid_spec=pltpu.PrefetchScalarGridSpec(
            num_scalar_prefetch=0,
            grid=grid,
            in_specs=[pl.BlockSpec((br, bc), lambda i, j: (i, j))],
            out_specs=pl.BlockSpec((br, bc), lambda i, j: (i, j)),
        ),
        compiler_params=pltpu.CompilerParams(
            dimension_semantics=("parallel", "parallel"),
            vmem_limit_bytes=_VMEM_LIMIT_BYTES,
        ),
        cost_estimate=pl.CostEstimate(
            flops=0,
            transcendentals=0,
            bytes_accessed=2 * rows * cols * x2.dtype.itemsize,
        ),
    )(x2)


def flatten(x: jax.Array, *, force_kernel: bool = False) -> jax.Array:
    """Flatten all but the leading (batch) dim, like torch x.view(N, -1)."""
    n = x.shape[0]
    flat = 1
    for d in x.shape[1:]:
        flat *= d
    total = n * flat
    total_bytes = total * x.dtype.itemsize

    # Flatten is a metadata-only reshape on a contiguous row-major buffer.
    # For tiny activations (kernel launch ~1 us >> data movement) or buffers
    # that cannot be tiled lane-densely, the fastest kernel is no kernel.
    if total % 128 != 0 or (total_bytes < _FAST_PATH_BYTES and not force_kernel):
        return x.reshape(n, flat)

    rows, cols = _choose_slab(n, flat)
    x2 = x.reshape(rows, cols)            # free (metadata-only)
    y2 = _flatten_copy(x2)                # lane-dense streaming copy
    return y2.reshape(n, flat)            # free (metadata-only)


if __name__ == "__main__":
    key = jax.random.PRNGKey(0)

    # Small NCHW input consistent with a typical conv feature map.
    x = jax.random.normal(key, (2, 4, 16, 16), dtype=jnp.float32)
    ref = x.reshape(x.shape[0], -1)

    # Default path: tiny input -> metadata-only reshape (fastest possible).
    y_fast = jax.block_until_ready(flatten(x))
    assert y_fast.shape == (2, 4 * 16 * 16) and y_fast.dtype == x.dtype
    assert jnp.array_equal(y_fast, ref)

    # Kernel path: force the Pallas lane-dense tiled copy to run once.
    y_kern = jax.block_until_ready(flatten(x, force_kernel=True))
    assert y_kern.shape == (2, 4 * 16 * 16) and y_kern.dtype == x.dtype
    assert jnp.array_equal(y_kern, ref)

    # bf16 case exercises the dtype-aware (16-row) sublane packing branch.
    xb = jax.random.normal(key, (4, 8, 16, 16), dtype=jnp.bfloat16)
    yb = jax.block_until_ready(flatten(xb, force_kernel=True))
    assert jnp.array_equal(yb, xb.reshape(4, -1))

    # Non-128-alignable total falls back to the (exact) reshape path.
    xo = jax.random.normal(key, (3, 5, 7), dtype=jnp.float32)
    yo = jax.block_until_ready(flatten(xo))
    assert jnp.array_equal(yo, xo.reshape(3, -1))

    print("KERNEL_OK")
</pallas_src>

<mosaic_0001>
module attributes {stable_mosaic.version = 11 : i64} {
  func.func @_copy_kernel(%arg0: i32, %arg1: i32, %arg2: memref<2x512xf32, #tpu.memory_space<vmem>>, %arg3: memref<2x512xf32, #tpu.memory_space<vmem>>) attributes {dimension_semantics = [#tpu.dimension_semantics<parallel>, #tpu.dimension_semantics<parallel>], iteration_bounds = array<i64: 1, 2>, scalar_prefetch = 0 : i64, scratch_operands = 0 : i64, tpu.core_type = #tpu.core_type<tc>, window_params = [{transform_indices = @transform_0, window_bounds = array<i64: 2, 512>}, {transform_indices = @transform_1, window_bounds = array<i64: 2, 512>}]} {
    %c0 = arith.constant 0 : index
    %c0_0 = arith.constant 0 : index
    %0 = vector.load %arg2[%c0, %c0_0] : memref<2x512xf32, #tpu.memory_space<vmem>>, vector<2x512xf32>
    %c0_1 = arith.constant 0 : index
    %c0_2 = arith.constant 0 : index
    %1 = vector.load %arg3[%c0_1, %c0_2] : memref<2x512xf32, #tpu.memory_space<vmem>>, vector<2x512xf32>
    tpu.vector_store %arg3[%c0_1, %c0_2], %0 {strides = array<i32>} : memref<2x512xf32, #tpu.memory_space<vmem>>, vector<2x512xf32>,
    return
  }
  func.func @transform_0(%arg0: i32, %arg1: i32) -> (i32, i32) {
    %c0_i32 = arith.constant 0 : i32
    return %arg0, %arg1 : i32, i32
  }
  func.func @transform_1(%arg0: i32, %arg1: i32) -> (i32, i32) {
    %c0_i32 = arith.constant 0 : i32
    return %arg0, %arg1 : i32, i32
  }
}

</mosaic_0001>

<bundles_post_ra>
// kernel: tpu_custom_call.1
= control target key start
LH: loop header
LB: loop body
LE: loop exit
PB: predicated region body
PF: predicated region fallthrough
CT: control target
= control target key end

     0   :  { %6 = vsyncpa [#allocation3], 0  ;;  %s633_s0 = inlined_call_operand.hbm [shape: f32[2,1024], index: 0, kind: input, shape index: {}]   ;;  %s634_s1 = inlined_call_operand.hbm [shape: f32[2,1024], index: 1, kind: output, shape index: {}]  }
   0x1   :  { %8 = vsyncpa [#allocation3 + $0x1], 0 }
   0x2   :  { %9 = vsyncpa [#allocation4], 0 }
   0x3   :  { %11 = vsyncpa [#allocation4 + $0x1], 0  ;;  %s461_s6 = smov 0   ;;  %s463_s7 = smov 0  }
   0x4   :  { %s465_s8 = smov 0   ;;  %s467_s9 = smov 0  }
   0x5   :  { %s469_s10 = smov 0   ;;  %s471_s11 = smov 0  }
   0x6 LB: > { %s256_s12 = sadd.s32 4294967295, %s447_s11   ;;  %s257_s13 = sadd.s32 4294967294, %s447_s11   ;;  %s447_s11 = sphi %s471_s11, %s17_s11   ;;  %s443_s10 = sphi %s469_s10, %s650_s10   ;;  %s439_s9 = sphi %s467_s9, %s649_s9   ;;  %s435_s8 = sphi %s465_s8, %s648_s8   ;;  %s431_s7 = sphi %s463_s7, %s647_s7   ;;  %s427_s6 = sphi %s461_s6, %s646_s6  }
   0x7   : > { %s26_s14 = sadd.s32 1, %s443_s10  ;;  %s38_s15 = sadd.s32 1, %s435_s8 }
   0x8   : > { %p27_p0 = scmp.ge.s32.totalorder %s26_s14, 2  ;;  %p45_p1 = scmp.ne.s32.totalorder %s435_s8, %s431_s7 }
   0x9   : > { %p46_p2 = scmp.eq.s32.totalorder %s447_s11, 0  ;;  %p51_p3 = scmp.ne.s32.totalorder %s431_s7, %s427_s6 }
   0xa   : > { %s652_s14 = smov (%p27_p0, %s26_s14), 0  ;;  %p52_p5 = scmp.eq.s32.totalorder %s256_s12, 0 }
   0xb   : > { %p502_p4 = por %p46_p2, %p45_p1  ;;  %s34_s17 = ssub.s32 %s443_s10, %s652_s14 }
   0xc   : > { %p77_p6 = scmp.eq.s32.totalorder %s256_s12, 1  ;;  %p36_p7 = scmp.eq.s32.totalorder %s34_s17, 0 }
   0xd   : > { %p508_p8 = por %p52_p5, %p51_p3  ;;  %p83_p10 = scmp.eq.s32.totalorder %s257_s13, 1 }
   0xe   : > { %p512_p9 = por %p77_p6, %p45_p1  ;;  %p285_p13 = scmp.lt.s32.totalorder %s447_s11, 2 }
   0xf   : > { %s517_s20 = scalar_select %p36_p7, %s435_s8, %s38_s15  }
  0x10   : > { %s638_s19 = scalar_select %p512_p9, 1, 0 }
  0x11   : > { %p519_p11 = por %p83_p10, %p51_p3  ;;  %s103_s22 = sand.u32 1, %s435_s8  }
  0x12   : > { %s260_s23 = sshll.u32 %s103_s22, 3  ;;  %s271_s24 = sshll.u32 %s443_s10, 7 }
  0x13   : > { %s639_s21 = scalar_select %p519_p11, 1, 0 }
  0x14   : > { %s530_s27 = scalar_lea.hbm %s633_s0, %s271_s24  ;;  %s107_s28 = scalar_lea.vmem [#allocation2], %s260_s23 }
  0x15   : > { %s117_s29 = sshll.u32 %s107_s28, 4  ;;  %p536_p0 = pnand %p285_p13, %p502_p4  ;;  %s532_s29 = int_to_ptr.vmem [resolvable:$true] %s117_s29 }
  0x16   : > { %s104_s2 = scalar_lea.sflag [#allocation3], %s103_s22  ;;  %s335_s3 = scalar_lea.hbm %s530_s27, 128 }
  0x17   : > { %p336_p3 = scmp.ne.s32.totalorder %s530_s27, %s335_s3  ;;  %p337_p5 = pneg %p536_p0 }
  0x18   : > { %s340_s12 = scalar_lea.hbm %s633_s0, 256  ;;  %p341_p4 = scmp.lt.u32.totalorder %s530_s27, %s633_s0 }
  0x19   : > { %p338_p6 = pnand %p337_p5, %p336_p3  ;;  %p342_p10 = scmp.lt.u32.totalorder %s340_s12, %s335_s3 }
  0x1a   : > { %p344_p12 = scmp.lt.u32.totalorder %s335_s3, %s530_s27 }
  0x1b   : > { %p339_p7 = pneg %p338_p6  ;;  %p343_p13 = por %p342_p10, %p341_p4 }
  0x1d   : > { %p345_p1 = por %p344_p12, %p343_p13 }
  0x1f   : > { %p346_p2 = pnand %p345_p1, %p339_p7 }
  0x21   : > { %349 = shalt.err (!%p346_p2)
}
  0x22   : > { %s350_s16 = scalar_lea.vmem %s532_s29, 128  ;;  %s449_s17 = smov [#allocation2]  }
  0x23   : > { %p351_p3 = scmp.ne.s32.totalorder %s532_s29, %s350_s16  ;;  %s355_s22 = sshll.u32 %s449_s17, 4  ;;  %s356_s22 = int_to_ptr.vmem [resolvable:$false] %s355_s22 }
  0x24   : > { %s357_s23 = scalar_lea.vmem %s356_s22, 256  ;;  %p358_p9 = scmp.lt.s32.totalorder %s532_s29, %s356_s22 }
  0x25   : > { %p353_p6 = pnand %p351_p3, %p337_p5  ;;  %p359_p4 = scmp.lt.s32.totalorder %s357_s23, %s350_s16 }
  0x27   : > { %p354_p11 = pneg %p353_p6  ;;  %p360_p10 = por %p359_p4, %p358_p9 }
  0x29   : > { %p361_p12 = pnand %p360_p10, %p354_p11 }
  0x2b   : > { %364 = shalt.err (!%p361_p12)
}
  0x2c   : > { %280 = dma.hbm_to_vmem [thread:$0]  (!%p536_p0), %s530_s27, 128, %s532_s29, %s104_s2  }
  0x2d   : > { %p641_p1 = scmp.lt.s32.totalorder %s447_s11, 3  ;;  %p642_p2 = scmp.ge.s32.totalorder %s447_s11, 1 }
  0x2f   : > { %p123_p5 = pnand %p642_p2, %p641_p1 }
  0x30   : > { %s572_s24 = sand.u32 (!%p123_p5), 1, %s431_s7  }
  0x31   : > { %126 = sbr.rel (%p123_p5) target bundleno = 83 (0x53), region = 24  ;;  %s264_s25 = sshll.u32 (!%p123_p5), %s572_s24, 3 }
  0x32   : > { %s129_s26 = scalar_lea.sflag (!%p123_p5), [#allocation3], %s572_s24  ;;  %s132_s28 = scalar_lea.vmem (!%p123_p5), [#allocation2], %s264_s25 }
  0x38   : > { %418 = dma.done.wait (%p508_p8), %s129_s26, 128  }
  0x39   : > { %420 = vsyncadd (%p508_p8), %s129_s26, 4294967168  ;;  %s150_s27 = scalar_lea.vmem [#allocation5], %s264_s25  ;;  %s272_s30 = sshll.u32 %s439_s9, 7  ;;  %v153_v0 = vld [vmem:[%s132_s28] sm:$0xff] }
  0x3a   : > { %s172_s29 = sshll.u32 %s150_s27, 4  ;;  %s586_s4 = scalar_lea.hbm %s634_s1, %s272_s30  ;;  %154 = vst [vmem:[%s150_s27] sm:$0xff] %v153_v0  ;;  %s581_s29 = int_to_ptr.vmem [resolvable:$true] %s172_s29 }
  0x3b   : > { %s156_s18 = scalar_lea.sflag [#allocation4], %s572_s24  ;;  %s365_s5 = scalar_lea.vmem %s581_s29, 128 }
  0x3c   : > { %p366_p8 = scmp.ne.s32.totalorder %s581_s29, %s365_s5  ;;  %p643_p9 = scmp.ne.s32.totalorder %s638_s19, 0 }
  0x3d   : > { %s450_s12 = smov [#allocation5]  }
  0x3e   : > { %p367_p11 = pnand %p366_p8, %p643_p9  ;;  %s369_s9 = sshll.u32 %s450_s12, 4  ;;  %s370_s9 = int_to_ptr.vmem [resolvable:$false] %s369_s9 }
  0x3f   : > { %s371_s13 = scalar_lea.vmem %s370_s9, 256  ;;  %p372_p7 = scmp.lt.s32.totalorder %s581_s29, %s370_s9 }
  0x40   : > { %p368_p0 = pneg %p367_p11  ;;  %p373_p13 = scmp.lt.s32.totalorder %s371_s13, %s365_s5 }
  0x42   : > { %p374_p3 = por %p373_p13, %p372_p7 }
  0x44   : > { %p375_p6 = pnand %p374_p3, %p368_p0 }
  0x46   : > { %378 = shalt.err (!%p375_p6)
}
  0x47   : > { %s379_s15 = scalar_lea.hbm %s586_s4, 128  ;;  %s383_s22 = scalar_lea.hbm %s634_s1, 256 }
  0x48   : > { %p380_p4 = scmp.ne.s32.totalorder %s586_s4, %s379_s15  ;;  %p384_p1 = scmp.lt.u32.totalorder %s586_s4, %s634_s1 }
  0x49   : > { %p385_p2 = scmp.lt.u32.totalorder %s383_s22, %s379_s15  ;;  %p387_p8 = scmp.lt.u32.totalorder %s379_s15, %s586_s4 }
  0x4a   : > { %p381_p10 = pnand %p380_p4, %p643_p9 }
  0x4b   : > { %p386_p5 = por %p385_p2, %p384_p1 }
  0x4c   : > { %p382_p12 = pneg %p381_p10 }
  0x4d   : > { %p388_p11 = por %p387_p8, %p386_p5 }
  0x4f   : > { %p389_p0 = pnand %p388_p11, %p382_p12 }
  0x51   : > { %392 = shalt.err (!%p389_p0)
}
  0x52   : > { %275 = dma.vmem_to_hbm [thread:$0]  (%p643_p9), %s581_s29, 128, %s586_s4, %s156_s18  }
  0x53 PF: > { %s184_s25 = sand.u32 1, %s427_s6   ;;  %p644_p7 = scmp.ne.s32.totalorder %s639_s21, 0 }
  0x54   : > { %p645_p13 = scmp.ge.s32.totalorder %s447_s11, 2  ;;  %s185_s26 = scalar_lea.sflag [#allocation4], %s184_s25 }
  0x56   : > { %p282_p3 = pnand %p645_p13, %p644_p7 }
  0x58   : > { %422 = dma.done.wait (!%p282_p3), %s185_s26, 128  }
  0x59   : > { %424 = vsyncadd (!%p282_p3), %s185_s26, 4294967168  ;;  %s17_s11 = sadd.s32 1, %s447_s11   ;;  %s646_s6 = smov %s431_s7 }
  0x5a   : > { %p14_p6 = scmp.ge.s32.totalorder %s17_s11, 4   ;;  %s647_s7 = smov %s435_s8 }
  0x5b   : > { %s648_s8 = smov %s517_s20  ;;  %s649_s9 = smov %s443_s10 }
  0x5c   : > { %s650_s10 = smov %s652_s14  ;;  %16 = sbr.rel (!%p14_p6) target bundleno = 6 (0x6), region = 69 }
  0x63   :  { %190 = vsyncpa [#allocation3], 1 }
  0x64   :  { %192 = vsyncpa [#allocation3 + $0x1], 1 }
  0x65   :  { %193 = vsyncpa [#allocation4], 1 }
  0x66   :  { %195 = vsyncpa [#allocation4 + $0x1], 1 }

</bundles_post_ra>
